<compile_context>
chip_gen: v6e
topology: v6e:2x2x1
jax: 0.10.0
libtpu: 0.0.40
codegen_flags: <defaults>
</compile_context>

<pallas_src>
import functools

import jax
import jax.numpy as jnp
from jax import lax
from jax.experimental import pallas as pl
from jax.experimental.pallas import tpu as pltpu


def _round_up(x, m):
    return (x + m - 1) // m * m


# ----------------------- pltpu.roll convention probe ----------------------- #

@functools.lru_cache(maxsize=None)
def _roll_sign():
    """+1 if pltpu.roll matches jnp.roll (out[i] = x[(i - shift) % n]), else -1.
    Must be called OUTSIDE any jit trace (launches a tiny probe kernel and reads
    the result on the host); head_forward_eval warms it eagerly."""
    def probe(x_ref, o_ref):
        o_ref[...] = pltpu.roll(x_ref[...], 1, axis=1)

    x = jnp.broadcast_to(jnp.arange(128, dtype=jnp.float32), (8, 128))
    y = pl.pallas_call(
        probe, out_shape=jax.ShapeDtypeStruct((8, 128), jnp.float32))(x)
    if bool(jnp.array_equal(y, jnp.roll(x, 1, axis=1))):
        return 1
    if bool(jnp.array_equal(y, jnp.roll(x, -1, axis=1))):
        return -1
    raise RuntimeError("Unexpected pltpu.roll semantics")


# ------------------------------ Pallas kernel ------------------------------ #

def _head_kernel(x_ref, *refs, num_layers, W, HW, roll_sign):
    # x_ref : (1, Cin0_p, HWp)  one batch element; channels on sublanes,
    #                           flattened spatial (zero tail >= W lanes) on lanes
    # refs  : (w_0, b_0, ..., w_{L-1}, b_{L-1}, o_ref)
    #   w_l : (9, Cout_l, Cin_l_p) bf16, tap index t = (dy+1)*3 + (dx+1)
    #   b_l : (Cout_l, 1) f32
    #   o_ref: (1, Cpred, HW) f32  (unpadded spatial width -> no wrapper slice)
    o_ref = refs[-1]
    wb = refs[:-1]
    HWp = x_ref.shape[-1]

    # Lane-index masks, built once for all layers (f32 multiplicands).
    pos = lax.broadcasted_iota(jnp.int32, (1, HWp), 1)
    col = pos - (pos // W) * W
    in_img_f = (pos < HW).astype(jnp.float32)      # valid (non-tail) lanes
    left_f = (col >= 1).astype(jnp.float32)        # dx = -1 taps valid
    right_f = (col <= W - 2).astype(jnp.float32)   # dx = +1 taps valid

    def conv3x3(cur, w_ref, b_ref):
        # cur: (Cin, HWp) f32 with zeroed tail lanes [HW, HWp).
        cin_p = w_ref.shape[2]
        if cur.shape[0] < cin_p:                   # static; sublane-align chans
            cur = jnp.concatenate(
                [cur, jnp.zeros((cin_p - cur.shape[0], HWp), jnp.float32)],
                axis=0)

        def tap_dot(dy, dx):
            off = dy * W + dx
            if off == 0:
                r = cur
            else:
                shift = ((-off) if roll_sign > 0 else off) % HWp
                r = pltpu.roll(cur, shift, axis=1)          # XLU lane rotate
            t = (dy + 1) * 3 + (dx + 1)
            # bf16 operands, f32 accumulation on the MXU.
            return jnp.dot(w_ref[t], r.astype(jnp.bfloat16),
                           preferred_element_type=jnp.float32)

        def col_group(dx):                         # sum over dy at fixed dx
            return tap_dot(-1, dx) + tap_dot(0, dx) + tap_dot(1, dx)

        # Row (dy) out-of-image reads land in the zeroed tail -> no dy masks.
        acc = col_group(0)
        acc = acc + left_f * col_group(-1)
        acc = acc + right_f * col_group(1)
        return acc + b_ref[...]

    cur = x_ref[0].astype(jnp.float32)
    for layer in range(num_layers):
        acc = conv3x3(cur, wb[2 * layer], wb[2 * layer + 1])
        if layer < num_layers - 1:
            # ReLU + re-zero the tail lanes (they must stay zero so the next
            # layer's wrap-around row reads act as zero padding).
            cur = jnp.maximum(acc, 0.0) * in_img_f
        else:
            o_ref[0] = acc[:, :HW].astype(o_ref.dtype)


# ------------------------------- wrappers ---------------------------------- #

def prep_merged_params(weights_oihw, biases):
    """Merged conv weights (OIHW) -> per-tap (9, Cout, Cin_pad) bf16;
    biases -> (Cout, 1) f32."""
    w_taps, b_cols = [], []
    for w, b in zip(weights_oihw, biases):
        cout, cin, kh, kw = w.shape
        assert (kh, kw) == (3, 3)
        cin_p = _round_up(cin, 16)                # bf16 sublane-friendly channels
        if cin_p > cin:
            w = jnp.pad(w, ((0, 0), (0, cin_p - cin), (0, 0), (0, 0)))
        # (Cout, Cin_p, Ky, Kx) -> (Ky, Kx, Cout, Cin_p) -> (9, Cout, Cin_p)
        w_taps.append(jnp.transpose(w, (2, 3, 0, 1))
                      .reshape(9, cout, cin_p).astype(jnp.bfloat16))
        b_cols.append(b.reshape(cout, 1).astype(jnp.float32))
    return w_taps, b_cols


def _head_apply_level(x_nchw, w_list, b_list, roll_sign):
    """Fused eval-mode head on one NCHW feature map (traced under jit)."""
    N, Cin, H, W = x_nchw.shape
    HW = H * W
    # Lane axis padded to a 256-multiple with a >= W zeroed tail: the tail acts
    # as the conv's top/bottom zero padding for the roll-based row shifts.
    HWp = _round_up(HW + W, 256)
    cin0_p = w_list[0].shape[2]
    cpred = w_list[-1].shape[1]
    num_layers = len(w_list)

    # NCHW -> (N, C, H*W) is a free reshape; pad channels/lanes once (fuses
    # under jit).  Intermediate layers are padded in-register inside the kernel.
    x = x_nchw.reshape(N, Cin, HW).astype(jnp.float32)
    x = jnp.pad(x, ((0, 0), (0, cin0_p - Cin), (0, HWp - HW)))

    kernel = functools.partial(_head_kernel, num_layers=num_layers, W=W, HW=HW,
                               roll_sign=roll_sign)

    in_specs = [pl.BlockSpec((1, cin0_p, HWp), lambda n: (n, 0, 0))]
    operands = [x]
    for w3, b2 in zip(w_list, b_list):
        # TODO(synk): single-buffer these constant-index weight/bias blocks
        # (pipeline_mode=pl.Buffered(1)) once verified on the target JAX build.
        in_specs.append(pl.BlockSpec(w3.shape, lambda n: (0, 0, 0)))
        in_specs.append(pl.BlockSpec(b2.shape, lambda n: (0, 0)))
        operands.extend([w3, b2])

    # TODO(synk): for production-size maps (Cin~256, HW~15k) add a spatial grid
    # axis over the lane dim (row-aligned tiles + 1-row halo, tail re-zeroed per
    # tile) so blocks fit v7x's 64 MiB VMEM and N=1 still yields >=2 parallel
    # grid iterations; at these sizes one block per batch element fits trivially.
    out = pl.pallas_call(
        kernel,
        out_shape=jax.ShapeDtypeStruct((N, cpred, HW), jnp.float32),
        grid_spec=pltpu.PrefetchScalarGridSpec(
            num_scalar_prefetch=0,
            grid=(N,),
            in_specs=in_specs,
            out_specs=pl.BlockSpec((1, cpred, HW), lambda n: (n, 0, 0)),
        ),
        compiler_params=pltpu.CompilerParams(
            dimension_semantics=("parallel",),
            vmem_limit_bytes=64 * 1024 * 1024),
    )(*operands)
    return out.reshape(N, cpred, H, W)            # already NCHW


_head_apply_level_jit = jax.jit(_head_apply_level,
                                static_argnames=("roll_sign",))


def head_forward_eval(features_nchw, weights_oihw, biases):
    w_list, b_list = prep_merged_params(weights_oihw, biases)
    sign = _roll_sign()                 # eager probe, outside any jit trace
    w_list, b_list = tuple(w_list), tuple(b_list)
    return [_head_apply_level_jit(x, w_list, b_list, roll_sign=sign)
            for x in features_nchw]


# -------------------------- parameter construction ------------------------- #

def init_head_params(key, in_channels, conv_channels, num_convs, pred_channels):
    """Deterministic synthetic params; returns merged-BN weights in OIHW (f32)."""
    weights_oihw, biases = [], []
    channels = in_channels
    for _ in range(num_convs):
        key, kw, kg, kb, km, kv = jax.random.split(key, 6)
        w = 0.01 * jax.random.normal(kw, (conv_channels, channels, 3, 3),
                                     jnp.float32)
        gamma = 1.0 + 0.1 * jax.random.normal(kg, (conv_channels,), jnp.float32)
        beta = 0.05 * jax.random.normal(kb, (conv_channels,), jnp.float32)
        running_mean = 0.1 * jax.random.normal(km, (conv_channels,), jnp.float32)
        running_var = jax.random.uniform(kv, (conv_channels,), jnp.float32,
                                         0.5, 1.5)
        # _bn_convert(): fold BN into conv (module uses eps=1e-10 explicitly)
        bn_scale = gamma * lax.rsqrt(running_var + 1e-10)
        bn_bias = beta - bn_scale * running_mean
        weights_oihw.append(w * bn_scale[:, None, None, None])
        biases.append(bn_bias)
        channels = conv_channels

    key, kw = jax.random.split(key)
    w_pred = 0.01 * jax.random.normal(kw, (pred_channels, channels, 3, 3),
                                      jnp.float32)
    weights_oihw.append(w_pred)
    biases.append(jnp.zeros((pred_channels,), jnp.float32))
    return weights_oihw, biases


# ---------------------------- pure-JAX reference ---------------------------- #

def _ref_conv(x_nchw, w_oihw, b):
    y = lax.conv_general_dilated(
        x_nchw, w_oihw, window_strides=(1, 1), padding=((1, 1), (1, 1)),
        dimension_numbers=("NCHW", "OIHW", "NCHW"),
        precision=lax.Precision.HIGHEST)
    return y + b[None, :, None, None]


def head_forward_ref(features_nchw, weights_oihw, biases, num_convs):
    preds = []
    for x in features_nchw:
        h = x.astype(jnp.float32)
        for i in range(num_convs):
            h = jnp.maximum(_ref_conv(h, weights_oihw[i], biases[i]), 0.0)
        preds.append(_ref_conv(h, weights_oihw[-1], biases[-1]))
    return preds


# ----------------------------------- main ----------------------------------- #

if __name__ == "__main__":
    in_channels = 4
    conv_channels = 32
    num_convs = 2
    pred_channels = 8

    key = jax.random.PRNGKey(0)
    key, kp, kf0, kf1 = jax.random.split(key, 4)

    weights_oihw, biases = init_head_params(
        kp, in_channels, conv_channels, num_convs, pred_channels)

    # Two FPN-like levels (NCHW, as PyTorch would provide).
    features = [
        jax.random.normal(kf0, (2, in_channels, 16, 16), jnp.float32),
        jax.random.normal(kf1, (2, in_channels, 8, 8), jnp.float32),
    ]

    preds = head_forward_eval(features, weights_oihw, biases)
    preds = jax.block_until_ready(preds)

    refs = head_forward_ref(features, weights_oihw, biases, num_convs)
    for p, r in zip(preds, refs):
        assert p.shape == r.shape
        # bf16 MXU operands (f32 accumulation) vs f32 HIGHEST-precision ref.
        assert jnp.allclose(p, r, rtol=3e-2, atol=1e-3), float(
            jnp.max(jnp.abs(p - r)))

    print("KERNEL_OK")
</pallas_src>

<mosaic_0001>
module attributes {stable_mosaic.version = 11 : i64} {
  func.func @probe(%arg0: memref<8x128xf32, #tpu.memory_space<vmem>>, %arg1: memref<8x128xf32, #tpu.memory_space<vmem>>) attributes {dimension_semantics = [], scalar_prefetch = 0 : i64, scratch_operands = 0 : i64, tpu.core_type = #tpu.core_type<tc>} {
    %c0 = arith.constant 0 : index
    %c0_0 = arith.constant 0 : index
    %0 = vector.load %arg0[%c0, %c0_0] : memref<8x128xf32, #tpu.memory_space<vmem>>, vector<8x128xf32>
    %c1_i32 = arith.constant 1 : i32
    %1 = tpu.dynamic_rotate %0 by %c1_i32 dim 1 : vector<8x128xf32>, i32 -> vector<8x128xf32>
    %c0_1 = arith.constant 0 : index
    %c0_2 = arith.constant 0 : index
    %2 = vector.load %arg1[%c0_1, %c0_2] : memref<8x128xf32, #tpu.memory_space<vmem>>, vector<8x128xf32>
    tpu.vector_store %arg1[%c0_1, %c0_2], %1 {strides = array<i32>} : memref<8x128xf32, #tpu.memory_space<vmem>>, vector<8x128xf32>,
    return
  }
}

</mosaic_0001>

<bundles_post_ra>
// kernel: tpu_custom_call.1
= control target key start
LH: loop header
LB: loop body
LE: loop exit
PB: predicated region body
PF: predicated region fallthrough
CT: control target
= control target key end

     0   :  { %6 = vsyncpa [#allocation3], 0  ;;  %s106_s0 = inlined_call_operand.hbm [shape: f32[8,128], index: 0, kind: input, shape index: {}]   ;;  %s107_s1 = inlined_call_operand.hbm [shape: f32[8,128], index: 1, kind: output, shape index: {}]  }
   0x1   :  { %7 = vsyncpa [#allocation4], 0  ;;  %s87_s6 = smov [#allocation2]  }
   0x2   :  { %s14_s7 = sshll.u32 %s87_s6, 4  ;;  %s15_s7 = int_to_ptr.vmem [resolvable:$true] %s14_s7 }
   0x3   :  { %s51_s8 = scalar_lea.vmem %s15_s7, 128  ;;  %p56_p1 = scmp.lt.s32.totalorder %s15_s7, %s15_s7 }
   0x4   :  { %p52_p0 = scmp.ne.s32.totalorder %s15_s7, %s51_s8  ;;  %p57_p2 = scmp.lt.s32.totalorder %s51_s8, %s51_s8 }
   0x6   :  { %p58_p3 = por %p57_p2, %p56_p1 }
   0x8   :  { %p59_p4 = pnand %p58_p3, %p52_p0 }
   0xa   :  { %62 = shalt.err (!%p59_p4)
}
   0xb   :  { %17 = dma.hbm_to_vmem [thread:$0]  %s106_s0, 128, %s15_s7, [#allocation3]  }
   0xc   :  { %83 = dma.done.wait [#allocation3], 128  }
   0xd   :  { %84 = vsyncadd [#allocation3], 4294967168  ;;  %v21_v0 = vld [vmem:[#allocation2] sm:$0xff]  ;;  %s88_s11 = smov 1   ;;  %s89_s12 = smov [#allocation5]  }
   0xe   :  { %22 = vrot.lane.b32.xlu0 %v21_v0, %s88_s11  ;;  %s31_s13 = sshll.u32 %s89_s12, 4  ;;  %s32_s13 = int_to_ptr.vmem [resolvable:$true] %s31_s13 }
   0xf   :  { %s63_s14 = scalar_lea.vmem %s32_s13, 128  ;;  %p68_p6 = scmp.lt.s32.totalorder %s32_s13, %s32_s13 }
  0x10   :  { %p64_p5 = scmp.ne.s32.totalorder %s32_s13, %s63_s14  ;;  %p69_p7 = scmp.lt.s32.totalorder %s63_s14, %s63_s14 }
  0x12   :  { %p70_p8 = por %p69_p7, %p68_p6 }
  0x14   :  { %p71_p9 = pnand %p70_p8, %p64_p5 }
  0x80   :  { %v23_v1 = vpop.permute.xlu0 %22 }
  0x81   :  { %24 = vst [vmem:[#allocation5] sm:$0xff] %v23_v1 }
  0x82   :  { %74 = shalt.err (!%p71_p9)
}
  0x83   :  { %34 = dma.vmem_to_hbm [thread:$0]  %s32_s13, 128, %s107_s1, [#allocation4]  }
  0x84   :  { %85 = dma.done.wait [#allocation4], 128  }
  0x85   :  { %86 = vsyncadd [#allocation4], 4294967168 }
  0x86   :  { %38 = vsyncpa [#allocation3], 1 }
  0x87   :  { %39 = vsyncpa [#allocation4], 1 }

</bundles_post_ra>
